<compile_context>
chip_gen: v6e
topology: v6e:2x2x1
jax: 0.10.0
libtpu: 0.0.40
codegen_flags: <defaults>
</compile_context>

<pallas_src>
import functools

import jax
import jax.numpy as jnp
from jax.experimental import pallas as pl
from jax.experimental.pallas import tpu as pltpu

_HID = 128     # lane width of every hidden layer inside the kernel
_ADV_HID = 64  # advantage/value hidden width in the PyTorch module


def dueling_q_kernel(x_ref, w1_ref, w_ref, b_ref, out_ref, *, inv_action_size):
    """One batch tile of the dueling-Q forward.

    x_ref  : (TB, S)       bf16  input states (batch tile, un-padded features)
    w1_ref : (S, 128)      bf16  first trunk layer
    w_ref  : (4, 128, 128) bf16  [w2, w3(pad), heads(wa1 | folded value), wa2(pad)]
    b_ref  : (8, 128)      f32   bias rows 0..4, zero elsewhere
    out_ref: (TB, 128)     f32   Q padded to 128 lanes (cols >= A sliced off)
    """
    x = x_ref[...]
    b = b_ref[...]

    # ---- shared trunk: 3 x (Linear -> ReLU), bf16 MXU / f32 accumulate ----
    h = jnp.maximum(jnp.dot(x, w1_ref[...], preferred_element_type=jnp.float32)
                    + b[0:1], 0.0).astype(jnp.bfloat16)
    h = jnp.maximum(jnp.dot(h, w_ref[0], preferred_element_type=jnp.float32)
                    + b[1:2], 0.0).astype(jnp.bfloat16)
    h = jnp.maximum(jnp.dot(h, w_ref[1], preferred_element_type=jnp.float32)
                    + b[2:3], 0.0).astype(jnp.bfloat16)
    # h columns 64..127 are exactly zero (zero-padded w3 / b3).

    # ---- fused heads matmul: cols 0..63 = advantage hidden, col 64 = value ----
    heads = jnp.dot(h, w_ref[2], preferred_element_type=jnp.float32) + b[3:4]
    v = heads[:, _ADV_HID:_ADV_HID + 1]                 # folded value head (TB,1)
    ah = jnp.maximum(heads, 0.0).astype(jnp.bfloat16)   # ReLU; extra cols feed
                                                        # zero rows of wa2.

    # ---- advantage second layer + ReLU (matches PyTorch) ----
    adv = jnp.maximum(jnp.dot(ah, w_ref[3], preferred_element_type=jnp.float32)
                      + b[4:5], 0.0)

    # ---- dueling combine: adv columns >= action_size are exactly zero, so the
    # full-lane sum equals the sum over the real action columns ----
    mean_adv = jnp.sum(adv, axis=1, keepdims=True) * inv_action_size
    out_ref[...] = (v + adv - mean_adv).astype(out_ref.dtype)


def pack_params(p):
    """Pack the 14 parameter tensors into the kernel's slabs.

    Call ONCE per parameter update (hoisted out of the per-step forward); the
    result is three small arrays (~160 KiB total in bf16) that stay resident
    in VMEM across all batch grid steps.
    """
    state_size = p["w1"].shape[0]
    action_size = p["wa2"].shape[1]

    # Invariants the packed layout relies on (folded value lives in column 64
    # of the heads slab; padded regions must be exactly zero for the
    # full-lane mean in the kernel).
    assert state_size <= _HID, "state_size must be <= 128"
    assert action_size <= _ADV_HID, "action_size must be <= 64"
    assert p["w2"].shape == (_HID, _HID)
    assert p["w3"].shape == (_HID, _ADV_HID)
    assert p["wa1"].shape == (_ADV_HID, _ADV_HID)
    assert p["wa2"].shape == (_ADV_HID, action_size)
    assert p["wv1"].shape == (_ADV_HID, _ADV_HID)
    assert p["wv2"].shape == (_ADV_HID, 1)

    # Fold value head: (h@wv1 + bv1)@wv2 + bv2 == h@(wv1@wv2) + (bv1@wv2 + bv2)
    wv_fold = p["wv1"] @ p["wv2"]                 # (64, 1)
    bv_fold = p["bv1"] @ p["wv2"] + p["bv2"]      # (1, 1)

    w1 = p["w1"].astype(jnp.bfloat16)             # (S, 128), no padding needed

    W = jnp.zeros((4, _HID, _HID), jnp.float32)
    W = W.at[0].set(p["w2"])                                   # 128 -> 128
    W = W.at[1, :, :_ADV_HID].set(p["w3"])                     # 128 -> 64 (pad)
    W = W.at[2, :_ADV_HID, :_ADV_HID].set(p["wa1"])            # advantage hidden
    W = W.at[2, :_ADV_HID, _ADV_HID:_ADV_HID + 1].set(wv_fold) # value in col 64
    W = W.at[3, :_ADV_HID, :action_size].set(p["wa2"])         # advantage out
    W = W.astype(jnp.bfloat16)

    Bs = jnp.zeros((8, _HID), jnp.float32)
    Bs = Bs.at[0, :].set(p["b1"][0])
    Bs = Bs.at[1, :].set(p["b2"][0])
    Bs = Bs.at[2, :_ADV_HID].set(p["b3"][0])
    Bs = Bs.at[3, :_ADV_HID].set(p["ba1"][0])
    Bs = Bs.at[3, _ADV_HID].set(bv_fold[0, 0])
    Bs = Bs.at[4, :action_size].set(p["ba2"][0])
    return w1, W, Bs, action_size


def _round_up(n, m):
    return -(-n // m) * m


def _batch_tiling(B):
    """Return (TB, B_pad).

    Big tiles amortize the ~0.35us/grid-step overhead and keep the MXU fed
    (K=N are fixed at 128, so M is the only axis that scales); medium/large
    batches get >= 2 steps so v7x's two TensorCores both receive work under
    dimension_semantics=("parallel",).
    """
    b8 = _round_up(B, 8)
    if b8 <= 256:
        return b8, b8                                  # single small step
    if b8 <= 4096:
        tb = _round_up(b8 // 2, 128)                   # two parallel steps
        return tb, 2 * tb
    tb = 2048                                          # large: 2048-row tiles
    return tb, _round_up(b8, tb)


@functools.partial(jax.jit, static_argnames=("action_size",))
def dueling_q_forward(x, w1, W, bias, action_size):
    """x: (B, state_size) f32; w1/W/bias: prepacked slabs from pack_params."""
    B, S = x.shape
    TB, B_pad = _batch_tiling(B)

    # Pad only the batch dimension (no 128-lane feature inflation) and cast
    # to bf16 for the MXU.
    x_pad = jnp.zeros((B_pad, S), jnp.bfloat16).at[:B].set(x.astype(jnp.bfloat16))

    out = pl.pallas_call(
        functools.partial(dueling_q_kernel, inv_action_size=1.0 / action_size),
        out_shape=jax.ShapeDtypeStruct((B_pad, _HID), jnp.float32),
        grid=(B_pad // TB,),
        in_specs=[
            pl.BlockSpec((TB, S), lambda i: (i, 0)),             # x: batch-tiled
            pl.BlockSpec((S, _HID), lambda i: (0, 0)),           # w1 resident
            pl.BlockSpec((4, _HID, _HID), lambda i: (0, 0, 0)),  # weight slab resident
            pl.BlockSpec((8, _HID), lambda i: (0, 0)),           # bias slab resident
        ],
        out_specs=pl.BlockSpec((TB, _HID), lambda i: (i, 0)),    # lane-dense out
        compiler_params=pltpu.CompilerParams(
            dimension_semantics=("parallel",),
            vmem_limit_bytes=32 * 1024 * 1024),
    )(x_pad, w1, W, bias)

    return out[:B, :action_size]


def init_params(key, state_size, action_size):
    """Deterministic init mimicking PyTorch's default Linear init:
    U(-1/sqrt(fan_in), 1/sqrt(fan_in)) for both weights and biases."""
    sizes = [
        ("w1", state_size, 128), ("w2", 128, 128), ("w3", 128, 64),
        ("wa1", 64, 64), ("wa2", 64, action_size),
        ("wv1", 64, 64), ("wv2", 64, 1),
    ]
    params = {}
    keys = jax.random.split(key, 2 * len(sizes))
    for i, (name, fan_in, fan_out) in enumerate(sizes):
        bound = 1.0 / jnp.sqrt(float(fan_in))
        w = jax.random.uniform(keys[2 * i], (fan_in, fan_out),
                               minval=-bound, maxval=bound, dtype=jnp.float32)
        b = jax.random.uniform(keys[2 * i + 1], (1, fan_out),
                               minval=-bound, maxval=bound, dtype=jnp.float32)
        params[name] = w
        params[name.replace("w", "b")] = b
    return params


def reference_forward(x, p):
    """Pure-JAX (f32) reference matching the PyTorch forward exactly (unfused)."""
    h = jnp.maximum(x @ p["w1"] + p["b1"], 0.0)
    h = jnp.maximum(h @ p["w2"] + p["b2"], 0.0)
    h = jnp.maximum(h @ p["w3"] + p["b3"], 0.0)
    a = jnp.maximum(h @ p["wa1"] + p["ba1"], 0.0)
    a = jnp.maximum(a @ p["wa2"] + p["ba2"], 0.0)
    v = h @ p["wv1"] + p["bv1"]
    v = v @ p["wv2"] + p["bv2"]
    return v + a - jnp.mean(a, axis=1, keepdims=True)


if __name__ == "__main__":
    state_size, action_size = 8, 4
    key = jax.random.PRNGKey(0)
    k_param, k_x1, k_x2 = jax.random.split(key, 3)
    params = init_params(k_param, state_size, action_size)

    # Pack parameters ONCE (hoisted out of the per-call forward path).
    w1, W, bias, A = pack_params(params)

    # Small batch: single grid step, TB = ceil8(B).
    x = jax.random.normal(k_x1, (2, state_size), dtype=jnp.float32)
    q = jax.block_until_ready(dueling_q_forward(x, w1, W, bias, A))
    q_ref = reference_forward(x, params)
    assert q.shape == (2, action_size)
    # bf16 matmuls => ~1e-2 relative differences vs the f32 reference.
    assert jnp.allclose(q, q_ref, atol=5e-2, rtol=5e-2), "mismatch vs reference (B=2)"

    # Medium batch: exercises the 2-step parallel batch grid, resident weight
    # slabs across steps, and batch padding.
    x2 = jax.random.normal(k_x2, (300, state_size), dtype=jnp.float32)
    q2 = jax.block_until_ready(dueling_q_forward(x2, w1, W, bias, A))
    q2_ref = reference_forward(x2, params)
    assert q2.shape == (300, action_size)
    assert jnp.allclose(q2, q2_ref, atol=5e-2, rtol=5e-2), "mismatch vs reference (B=300)"

    print("KERNEL_OK")
</pallas_src>

<mosaic_0001>
module attributes {stable_mosaic.version = 11 : i64} {
  func.func @dueling_q_kernel(%arg0: i32, %arg1: memref<8x8xbf16, #tpu.memory_space<vmem>>, %arg2: memref<8x128xbf16, #tpu.memory_space<vmem>>, %arg3: memref<4x128x128xbf16, #tpu.memory_space<vmem>>, %arg4: memref<8x128xf32, #tpu.memory_space<vmem>>, %arg5: memref<8x128xf32, #tpu.memory_space<vmem>>) attributes {dimension_semantics = [#tpu.dimension_semantics<parallel>], iteration_bounds = array<i64: 1>, scalar_prefetch = 0 : i64, scratch_operands = 0 : i64, tpu.core_type = #tpu.core_type<tc>, window_params = [{transform_indices = @transform_0, window_bounds = array<i64: 8, 8>}, {pipeline_mode = #tpu.pipeline_mode<synchronous>, transform_indices = @transform_1, window_bounds = array<i64: 8, 128>}, {pipeline_mode = #tpu.pipeline_mode<synchronous>, transform_indices = @transform_2, window_bounds = array<i64: 4, 128, 128>}, {pipeline_mode = #tpu.pipeline_mode<synchronous>, transform_indices = @transform_3, window_bounds = array<i64: 8, 128>}, {transform_indices = @transform_4, window_bounds = array<i64: 8, 128>}]} {
    %c0 = arith.constant 0 : index
    %c0_0 = arith.constant 0 : index
    %0 = vector.load %arg1[%c0, %c0_0] : memref<8x8xbf16, #tpu.memory_space<vmem>>, vector<8x8xbf16>
    %c0_1 = arith.constant 0 : index
    %c0_2 = arith.constant 0 : index
    %1 = vector.load %arg4[%c0_1, %c0_2] : memref<8x128xf32, #tpu.memory_space<vmem>>, vector<8x128xf32>
    %c0_3 = arith.constant 0 : index
    %c0_4 = arith.constant 0 : index
    %2 = vector.load %arg2[%c0_3, %c0_4] : memref<8x128xbf16, #tpu.memory_space<vmem>>, vector<8x128xbf16>
    %cst = arith.constant dense<0.000000e+00> : vector<8x128xf32>
    %3 = tpu.matmul %0, %2, %cst {dimension_numbers = #tpu.dot_dimension_numbers<[1], [0], [0], [1], [0, 0, 1, 1], [], []>} : vector<8x8xbf16>, vector<8x128xbf16>, vector<8x128xf32> -> vector<8x128xf32>
    %4 = vector.extract_strided_slice %1 {offsets = [0, 0], sizes = [1, 128], strides = [1, 1]} : vector<8x128xf32> to vector<1x128xf32>
    %5 = vector.broadcast %4 : vector<1x128xf32> to vector<8x128xf32>
    %6 = arith.addf %3, %5 : vector<8x128xf32>
    %cst_5 = arith.constant 0.000000e+00 : f32
    %7 = vector.broadcast %cst_5 : f32 to vector<8x128xf32>
    %8 = arith.maximumf %6, %7 : vector<8x128xf32>
    %9 = arith.truncf %8 : vector<8x128xf32> to vector<8x128xbf16>
    %c0_6 = arith.constant 0 : index
    %c0_7 = arith.constant 0 : index
    %c0_8 = arith.constant 0 : index
    %10 = vector.load %arg3[%c0_6, %c0_7, %c0_8] : memref<4x128x128xbf16, #tpu.memory_space<vmem>>, vector<1x128x128xbf16>
    %11 = vector.shape_cast %10 : vector<1x128x128xbf16> to vector<128x128xbf16>
    %cst_9 = arith.constant dense<0.000000e+00> : vector<8x128xf32>
    %12 = tpu.matmul %9, %11, %cst_9 {dimension_numbers = #tpu.dot_dimension_numbers<[1], [0], [0], [1], [0, 0, 1, 1], [], []>} : vector<8x128xbf16>, vector<128x128xbf16>, vector<8x128xf32> -> vector<8x128xf32>
    %13 = vector.extract_strided_slice %1 {offsets = [1, 0], sizes = [1, 128], strides = [1, 1]} : vector<8x128xf32> to vector<1x128xf32>
    %14 = vector.broadcast %13 : vector<1x128xf32> to vector<8x128xf32>
    %15 = arith.addf %12, %14 : vector<8x128xf32>
    %cst_10 = arith.constant 0.000000e+00 : f32
    %16 = vector.broadcast %cst_10 : f32 to vector<8x128xf32>
    %17 = arith.maximumf %15, %16 : vector<8x128xf32>
    %18 = arith.truncf %17 : vector<8x128xf32> to vector<8x128xbf16>
    %c1 = arith.constant 1 : index
    %c0_11 = arith.constant 0 : index
    %c0_12 = arith.constant 0 : index
    %19 = vector.load %arg3[%c1, %c0_11, %c0_12] : memref<4x128x128xbf16, #tpu.memory_space<vmem>>, vector<1x128x128xbf16>
    %20 = vector.shape_cast %19 : vector<1x128x128xbf16> to vector<128x128xbf16>
    %cst_13 = arith.constant dense<0.000000e+00> : vector<8x128xf32>
    %21 = tpu.matmul %18, %20, %cst_13 {dimension_numbers = #tpu.dot_dimension_numbers<[1], [0], [0], [1], [0, 0, 1, 1], [], []>} : vector<8x128xbf16>, vector<128x128xbf16>, vector<8x128xf32> -> vector<8x128xf32>
    %22 = vector.extract_strided_slice %1 {offsets = [2, 0], sizes = [1, 128], strides = [1, 1]} : vector<8x128xf32> to vector<1x128xf32>
    %23 = vector.broadcast %22 : vector<1x128xf32> to vector<8x128xf32>
    %24 = arith.addf %21, %23 : vector<8x128xf32>
    %cst_14 = arith.constant 0.000000e+00 : f32
    %25 = vector.broadcast %cst_14 : f32 to vector<8x128xf32>
    %26 = arith.maximumf %24, %25 : vector<8x128xf32>
    %27 = arith.truncf %26 : vector<8x128xf32> to vector<8x128xbf16>
    %c2 = arith.constant 2 : index
    %c0_15 = arith.constant 0 : index
    %c0_16 = arith.constant 0 : index
    %28 = vector.load %arg3[%c2, %c0_15, %c0_16] : memref<4x128x128xbf16, #tpu.memory_space<vmem>>, vector<1x128x128xbf16>
    %29 = vector.shape_cast %28 : vector<1x128x128xbf16> to vector<128x128xbf16>
    %cst_17 = arith.constant dense<0.000000e+00> : vector<8x128xf32>
    %30 = tpu.matmul %27, %29, %cst_17 {dimension_numbers = #tpu.dot_dimension_numbers<[1], [0], [0], [1], [0, 0, 1, 1], [], []>} : vector<8x128xbf16>, vector<128x128xbf16>, vector<8x128xf32> -> vector<8x128xf32>
    %31 = vector.extract_strided_slice %1 {offsets = [3, 0], sizes = [1, 128], strides = [1, 1]} : vector<8x128xf32> to vector<1x128xf32>
    %32 = vector.broadcast %31 : vector<1x128xf32> to vector<8x128xf32>
    %33 = arith.addf %30, %32 : vector<8x128xf32>
    %34 = vector.extract_strided_slice %33 {offsets = [0, 64], sizes = [8, 1], strides = [1, 1]} : vector<8x128xf32> to vector<8x1xf32>
    %cst_18 = arith.constant 0.000000e+00 : f32
    %35 = vector.broadcast %cst_18 : f32 to vector<8x128xf32>
    %36 = arith.maximumf %33, %35 : vector<8x128xf32>
    %37 = arith.truncf %36 : vector<8x128xf32> to vector<8x128xbf16>
    %c3 = arith.constant 3 : index
    %c0_19 = arith.constant 0 : index
    %c0_20 = arith.constant 0 : index
    %38 = vector.load %arg3[%c3, %c0_19, %c0_20] : memref<4x128x128xbf16, #tpu.memory_space<vmem>>, vector<1x128x128xbf16>
    %39 = vector.shape_cast %38 : vector<1x128x128xbf16> to vector<128x128xbf16>
    %cst_21 = arith.constant dense<0.000000e+00> : vector<8x128xf32>
    %40 = tpu.matmul %37, %39, %cst_21 {dimension_numbers = #tpu.dot_dimension_numbers<[1], [0], [0], [1], [0, 0, 1, 1], [], []>} : vector<8x128xbf16>, vector<128x128xbf16>, vector<8x128xf32> -> vector<8x128xf32>
    %41 = vector.extract_strided_slice %1 {offsets = [4, 0], sizes = [1, 128], strides = [1, 1]} : vector<8x128xf32> to vector<1x128xf32>
    %42 = vector.broadcast %41 : vector<1x128xf32> to vector<8x128xf32>
    %43 = arith.addf %40, %42 : vector<8x128xf32>
    %cst_22 = arith.constant 0.000000e+00 : f32
    %44 = vector.broadcast %cst_22 : f32 to vector<8x128xf32>
    %45 = arith.maximumf %43, %44 : vector<8x128xf32>
    %cst_23 = arith.constant dense<0.000000e+00> : vector<8xf32>
    %46 = vector.multi_reduction <add>, %45, %cst_23 [1] : vector<8x128xf32> to vector<8xf32>
    %47 = vector.shape_cast %46 : vector<8xf32> to vector<8x1xf32>
    %cst_24 = arith.constant 2.500000e-01 : f32
    %48 = vector.broadcast %cst_24 : f32 to vector<8x1xf32>
    %49 = arith.mulf %47, %48 : vector<8x1xf32>
    %50 = vector.broadcast %34 : vector<8x1xf32> to vector<8x128xf32>
    %51 = arith.addf %50, %45 : vector<8x128xf32>
    %52 = vector.broadcast %49 : vector<8x1xf32> to vector<8x128xf32>
    %53 = arith.subf %51, %52 : vector<8x128xf32>
    %c0_25 = arith.constant 0 : index
    %c0_26 = arith.constant 0 : index
    %54 = vector.load %arg5[%c0_25, %c0_26] : memref<8x128xf32, #tpu.memory_space<vmem>>, vector<8x128xf32>
    tpu.vector_store %arg5[%c0_25, %c0_26], %53 {strides = array<i32>} : memref<8x128xf32, #tpu.memory_space<vmem>>, vector<8x128xf32>,
    return
  }
  func.func @transform_0(%arg0: i32) -> (i32, i32) {
    %c0_i32 = arith.constant 0 : i32
    %c0_i32_0 = arith.constant 0 : i32
    return %arg0, %c0_i32 : i32, i32
  }
  func.func @transform_1(%arg0: i32) -> (i32, i32) {
    %c0_i32 = arith.constant 0 : i32
    %c0_i32_0 = arith.constant 0 : i32
    %c0_i32_1 = arith.constant 0 : i32
    return %c0_i32, %c0_i32_0 : i32, i32
  }
  func.func @transform_2(%arg0: i32) -> (i32, i32, i32) {
    %c0_i32 = arith.constant 0 : i32
    %c0_i32_0 = arith.constant 0 : i32
    %c0_i32_1 = arith.constant 0 : i32
    %c0_i32_2 = arith.constant 0 : i32
    return %c0_i32, %c0_i32_0, %c0_i32_1 : i32, i32, i32
  }
  func.func @transform_3(%arg0: i32) -> (i32, i32) {
    %c0_i32 = arith.constant 0 : i32
    %c0_i32_0 = arith.constant 0 : i32
    %c0_i32_1 = arith.constant 0 : i32
    return %c0_i32, %c0_i32_0 : i32, i32
  }
  func.func @transform_4(%arg0: i32) -> (i32, i32) {
    %c0_i32 = arith.constant 0 : i32
    %c0_i32_0 = arith.constant 0 : i32
    return %arg0, %c0_i32 : i32, i32
  }
}

</mosaic_0001>

<bundles_post_ra>
// kernel: dueling_q_forward.1
= control target key start
LH: loop header
LB: loop body
LE: loop exit
PB: predicated region body
PF: predicated region fallthrough
CT: control target
= control target key end

     0   :  { %9 = vsyncpa [#allocation3], 0  ;;  %s765_s15 = smov [#allocation2]   ;;  %s868_s0 = inlined_call_operand.vmem [shape: bf16[8,8], index: 0, kind: input, shape index: {}]   ;;  %s869_s1 = inlined_call_operand.vmem [shape: bf16[8,128], index: 1, kind: input, shape index: {}]   ;;  %s870_s2 = inlined_call_operand.hbm [shape: bf16[4,128,128], index: 2, kind: input, shape index: {}]   ;;  %s871_s3 = inlined_call_operand.vmem [shape: f32[8,128], index: 3, kind: input, shape index: {}]   ;;  %s872_s4 = inlined_call_operand.vmem [shape: f32[8,128], index: 4, kind: output, shape index: {}]  }
   0x1   :  { %s19_s16 = sshll.u32 %s765_s15, 4  ;;  %s20_s16 = int_to_ptr.vmem [resolvable:$true] %s19_s16 }
   0x2   :  { %s751_s17 = scalar_lea.vmem %s20_s16, 4096  ;;  %p756_p1 = scmp.lt.s32.totalorder %s20_s16, %s20_s16 }
   0x3   :  { %p752_p0 = scmp.ne.s32.totalorder %s20_s16, %s751_s17  ;;  %p757_p2 = scmp.lt.s32.totalorder %s751_s17, %s751_s17 }
   0x5   :  { %p758_p3 = por %p757_p2, %p756_p1 }
   0x7   :  { %p759_p4 = pnand %p758_p3, %p752_p0 }
   0x9   :  { %762 = shalt.err (!%p759_p4)
}
   0xa   :  { %s766_s18 = smov 64   ;;  %s767_s19 = smov 4  }
   0xb   :  { %25 = dma.hbm_to_vmem [thread:$0]  %s870_s2, 4096, %s20_s16, [#allocation3], %s766_s18, %s766_s18, %s767_s19  }
   0xc   :  { %763 = dma.done.wait [#allocation3], 4096  }
   0xd   :  { %764 = vsyncadd [#allocation3], 4294963200  ;;  %v768_v0 = vmov 0.0   ;;  %vm769_vm0 = vmmov 0   ;;  %vm43_vm1 = vcmask 1043456   ;;  %vm39_vm2 = vcmask 64512  }
   0xe   :  { %618 = vmatprep.subr.bf16.mxu0 %v768_v0  ;;  %620 = vmatprep.mubr.msk.bf16.mxu0 %vm769_vm0, %v768_v0  ;;  %v34_v1 = vld [vmem:[%s869_s1] sm:$0xf]  ;;  %v712_v5 = vld [vmem:[#allocation2 + $0x30] sm:$0xff]   ;;  %v713_v6 = vld [vmem:[#allocation2 + $0x28] sm:$0xff]   ;;  %v35_v18 = vlaneseq }
   0xf   :  { %624 = vmatprep.subr.bf16.mxu1 %v768_v0  ;;  %640 = vmatprep.mubr.msk.bf16.mxu1 %vm769_vm0, %v768_v0  ;;  %v45_v2 = vsel %vm43_vm1, %v34_v1, 0  ;;  %v711_v3 = vld [vmem:[#allocation2 + $0x38] sm:$0xff]   ;;  %v714_v7 = vld [vmem:[#allocation2 + $0x20] sm:$0xff]   ;;  %v716_v9 = vld [vmem:[#allocation2 + $0x10] sm:$0xff]  }
  0x10   :  { %619 = vmatpush3.bf16.msra.mxu0 %v45_v2  ;;  %v32_v4 = vld [vmem:[%s868_s0] sm:$0xf]  ;;  %625 = vmatpush3.bf16.msra.mxu1 %v711_v3  ;;  %v717_v10 = vld [vmem:[#allocation2 + $0x8] sm:$0xff]   ;;  %v718_v11 = vld [vmem:[#allocation2] sm:$0xff]   ;;  %v828_v19 = vshrl.u32 %v35_v18, 7 }
  0x11   :  { %644 = vmatprep.subr.bf16.mxu0 %v768_v0  ;;  %626 = vmatprep.subr.bf16.mxu1 %v768_v0  ;;  %v715_v8 = vld [vmem:[#allocation2 + $0x18] sm:$0xff]   ;;  %v720_v13 = vld [vmem:[#allocation2 + $0x70] sm:$0xff]   ;;  %v721_v14 = vld [vmem:[#allocation2 + $0x68] sm:$0xff]  }
  0x12   :  { %v719_v12 = vld [vmem:[#allocation2 + $0x78] sm:$0xff]   ;;  %v722_v15 = vld [vmem:[#allocation2 + $0x60] sm:$0xff]   ;;  %v724_v17 = vld [vmem:[#allocation2 + $0x50] sm:$0xff]   ;;  %v37_v20 = vsub.s32 0, %v828_v19  ;;  %v107_v38 = vsub.s32 1, %v828_v19  ;;  %v218_v55 = vsub.s32 2, %v828_v19 }
  0x13   :  { %621 = vmatmul.mubr.msk.bf16.vlgmr.msra.gmra.mxu0 %vm39_vm2, %v32_v4  ;;  %v723_v16 = vld [vmem:[#allocation2 + $0x58] sm:$0xff]   ;;  %v725_v30 = vld [vmem:[#allocation2 + $0x48] sm:$0xff]   ;;  %v726_v31 = vld [vmem:[#allocation2 + $0x40] sm:$0xff]   ;;  %v329_v3 = vsub.s32 3, %v828_v19 }
  0x14   :  { %660 = vmatprep.mubr.msk.bf16.mxu0 %vm769_vm0, %v768_v0  ;;  %627 = vmatpush3.bf16.msra.mxu1 %v712_v5  ;;  %v834_v21 = vld [vmem:[%s871_s3] sm:$0xff]  ;;  %v728_v33 = vld [vmem:[#allocation2 + $0xb0] sm:$0xff]   ;;  %v729_v34 = vld [vmem:[#allocation2 + $0xa8] sm:$0xff]  }
  0x15   :  { %628 = vmatprep.subr.bf16.mxu1 %v768_v0  ;;  %645 = vmatpush3.bf16.msra.mxu0 %v719_v12  ;;  %v38_v22 = vrot.slane %v834_v21, %v37_v20  ;;  %v727_v32 = vld [vmem:[#allocation2 + $0xb8] sm:$0xff]   ;;  %v730_v35 = vld [vmem:[#allocation2 + $0xa0] sm:$0xff]   ;;  %v732_v37 = vld [vmem:[#allocation2 + $0x90] sm:$0xff]   ;;  %v108_v39 = vrot.slane %v834_v21, %v107_v38  ;;  %v219_v56 = vrot.slane %v834_v21, %v218_v55  ;;  %v770_v12 = vmov 64  }
  0x16   :  { %646 = vmatprep.subr.bf16.mxu0 %v768_v0  ;;  %v731_v36 = vld [vmem:[#allocation2 + $0x98] sm:$0xff]   ;;  %v733_v47 = vld [vmem:[#allocation2 + $0x88] sm:$0xff]   ;;  %v734_v48 = vld [vmem:[#allocation2 + $0x80] sm:$0xff]   ;;  %v330_v4 = vrot.slane %v834_v21, %v329_v3  ;;  %710 = vset.pattern.permute.xlu0 %v770_v12 }
  0x17   :  { %v735_v49 = vld [vmem:[#allocation2 + $0xf8] sm:$0xff]   ;;  %v736_v50 = vld [vmem:[#allocation2 + $0xf0] sm:$0xff]   ;;  %v737_v51 = vld [vmem:[#allocation2 + $0xe8] sm:$0xff]  }
  0x18   :  { %629 = vmatpush3.bf16.msra.mxu1 %v713_v6  ;;  %v738_v52 = vld [vmem:[#allocation2 + $0xe0] sm:$0xff]   ;;  %v739_v53 = vld [vmem:[#allocation2 + $0xd8] sm:$0xff]   ;;  %v740_v54 = vld [vmem:[#allocation2 + $0xd0] sm:$0xff]  }
  0x19   :  { %630 = vmatprep.subr.bf16.mxu1 %v768_v0  ;;  %647 = vmatpush3.bf16.msra.mxu0 %v720_v13  ;;  %v741_v1 = vld [vmem:[#allocation2 + $0xc8] sm:$0xff]   ;;  %v742_v2 = vld [vmem:[#allocation2 + $0xc0] sm:$0xff]   ;;  %v440_v13 = vsub.s32 4, %v828_v19 }
  0x1a   :  { %648 = vmatprep.subr.bf16.mxu0 %v768_v0 }
  0x1c   :  { %631 = vmatpush3.bf16.msra.mxu1 %v714_v7 }
  0x1d   :  { %632 = vmatprep.subr.bf16.mxu1 %v768_v0  ;;  %649 = vmatpush3.bf16.msra.mxu0 %v721_v14 }
  0x1e   :  { %650 = vmatprep.subr.bf16.mxu0 %v768_v0 }
  0x20   :  { %633 = vmatpush3.bf16.msra.mxu1 %v715_v8 }
  0x21   :  { %634 = vmatprep.subr.bf16.mxu1 %v768_v0  ;;  %651 = vmatpush3.bf16.msra.mxu0 %v722_v15 }
  0x22   :  { %652 = vmatprep.subr.bf16.mxu0 %v768_v0 }
  0x24   :  { %635 = vmatpush3.bf16.msra.mxu1 %v716_v9 }
  0x25   :  { %636 = vmatprep.subr.bf16.mxu1 %v768_v0  ;;  %653 = vmatpush3.bf16.msra.mxu0 %v723_v16 }
  0x26   :  { %654 = vmatprep.subr.bf16.mxu0 %v768_v0 }
  0x28   :  { %637 = vmatpush3.bf16.msra.mxu1 %v717_v10 }
  0x29   :  { %638 = vmatprep.subr.bf16.mxu1 %v768_v0  ;;  %655 = vmatpush3.bf16.msra.mxu0 %v724_v17 }
  0x2a   :  { %656 = vmatprep.subr.bf16.mxu0 %v768_v0 }
  0x2c   :  { %639 = vmatpush3.bf16.msra.mxu1 %v718_v11 }
  0x2d   :  { %664 = vmatprep.subr.bf16.mxu1 %v768_v0  ;;  %657 = vmatpush3.bf16.msra.mxu0 %v725_v30 }
  0x2e   :  { %658 = vmatprep.subr.bf16.mxu0 %v768_v0 }
  0x31   :  { %659 = vmatpush3.bf16.msra.mxu0 %v726_v31 }
  0x32   :  { %684 = vmatprep.subr.bf16.mxu0 %v768_v0 }
  0xd3   :  { %v81_v23 = vpop.f32.mrf.mxu0 }
  0xd4   :  { %v82_v24 = vadd.f32 %v81_v23, %v38_v22 }
  0xd5   :  { %v622_v25 = vpop.f32.mrf.mxu0 }
  0xd6   :  { %v87_v26 = vmax.f32 %v82_v24, 0.0 }
  0xd7   :  { %v84_v27 = vpop.f32.mrf.mxu0 }
  0xd8   :  { %v88_v28 = vpack.c.bf16 %v87_v26, %v87_v26 }
  0xd9   :  { %v623_v29 = vpop.f32.mrf.mxu0 }
  0xda   :  { %641 = vmatmul.mubr.bf16.vlgmr.msra.gmra.mxu1 %v88_v28 }
  0xdb   :  { %680 = vmatprep.mubr.msk.bf16.mxu1 %vm769_vm0, %v768_v0  ;;  %665 = vmatpush3.bf16.msra.mxu1 %v727_v32 }
  0xdc   :  { %666 = vmatprep.subr.bf16.mxu1 %v768_v0 }
  0xdf   :  { %667 = vmatpush3.bf16.msra.mxu1 %v728_v33 }
  0xe0   :  { %668 = vmatprep.subr.bf16.mxu1 %v768_v0 }
  0xe3   :  { %669 = vmatpush3.bf16.msra.mxu1 %v729_v34 }
  0xe4   :  { %670 = vmatprep.subr.bf16.mxu1 %v768_v0 }
  0xe7   :  { %671 = vmatpush3.bf16.msra.mxu1 %v730_v35 }
  0xe8   :  { %672 = vmatprep.subr.bf16.mxu1 %v768_v0 }
  0xeb   :  { %673 = vmatpush3.bf16.msra.mxu1 %v731_v36 }
  0xec   :  { %674 = vmatprep.subr.bf16.mxu1 %v768_v0 }
  0xef   :  { %675 = vmatpush3.bf16.msra.mxu1 %v732_v37 }
  0xf0   :  { %676 = vmatprep.subr.bf16.mxu1 %v768_v0 }
  0xf3   :  { %677 = vmatpush3.bf16.msra.mxu1 %v733_v47 }
  0xf4   :  { %678 = vmatprep.subr.bf16.mxu1 %v768_v0 }
  0xf7   :  { %679 = vmatpush3.bf16.msra.mxu1 %v734_v48 }
 0x19a   :  { %v191_v40 = vpop.f32.mrf.mxu1 }
 0x19b   :  { %v192_v41 = vadd.f32 %v191_v40, %v108_v39 }
 0x19c   :  { %v642_v42 = vpop.f32.mrf.mxu1 }
 0x19d   :  { %v197_v43 = vmax.f32 %v192_v41, 0.0 }
 0x19e   :  { %v194_v44 = vpop.f32.mrf.mxu1 }
 0x19f   :  { %v198_v45 = vpack.c.bf16 %v197_v43, %v197_v43 }
 0x1a0   :  { %v643_v46 = vpop.f32.mrf.mxu1 }
 0x1a1   :  { %661 = vmatmul.mubr.bf16.vlgmr.msra.gmra.mxu0 %v198_v45 }
 0x1a2   :  { %700 = vmatprep.mubr.msk.bf16.mxu0 %vm769_vm0, %v768_v0  ;;  %685 = vmatpush3.bf16.msra.mxu0 %v735_v49 }
 0x1a3   :  { %686 = vmatprep.subr.bf16.mxu0 %v768_v0 }
 0x1a6   :  { %687 = vmatpush3.bf16.msra.mxu0 %v736_v50 }
 0x1a7   :  { %688 = vmatprep.subr.bf16.mxu0 %v768_v0 }
 0x1aa   :  { %689 = vmatpush3.bf16.msra.mxu0 %v737_v51 }
 0x1ab   :  { %690 = vmatprep.subr.bf16.mxu0 %v768_v0 }
 0x1ae   :  { %691 = vmatpush3.bf16.msra.mxu0 %v738_v52 }
 0x1af   :  { %692 = vmatprep.subr.bf16.mxu0 %v768_v0 }
 0x1b2   :  { %693 = vmatpush3.bf16.msra.mxu0 %v739_v53 }
 0x1b3   :  { %694 = vmatprep.subr.bf16.mxu0 %v768_v0 }
 0x1b6   :  { %695 = vmatpush3.bf16.msra.mxu0 %v740_v54 }
 0x1b7   :  { %696 = vmatprep.subr.bf16.mxu0 %v768_v0 }
 0x1ba   :  { %697 = vmatpush3.bf16.msra.mxu0 %v741_v1 }
 0x1bb   :  { %698 = vmatprep.subr.bf16.mxu0 %v768_v0  ;;  %v441_v0 = vrot.slane %v834_v21, %v440_v13 }
 0x1be   :  { %699 = vmatpush3.bf16.msra.mxu0 %v742_v2 }
 0x261   :  { %v302_v57 = vpop.f32.mrf.mxu0 }
 0x262   :  { %v303_v58 = vadd.f32 %v302_v57, %v219_v56 }
 0x263   :  { %v662_v59 = vpop.f32.mrf.mxu0 }
 0x264   :  { %v308_v60 = vmax.f32 %v303_v58, 0.0 }
 0x265   :  { %v305_v61 = vpop.f32.mrf.mxu0 }
 0x266   :  { %v309_v62 = vpack.c.bf16 %v308_v60, %v308_v60 }
 0x267   :  { %v663_v63 = vpop.f32.mrf.mxu0 }
 0x268   :  { %681 = vmatmul.mubr.bf16.vlgmr.msra.gmra.mxu1 %v309_v62 }
 0x328   :  { %v413_v5 = vpop.f32.mrf.mxu1 }
 0x329   :  { %v414_v6 = vadd.f32 %v413_v5, %v330_v4 }
 0x32a   :  { %v682_v7 = vpop.f32.mrf.mxu1 }
 0x32b   :  { %v419_v8 = vmax.f32 %v414_v6, 0.0 }
 0x32c   :  { %v416_v9 = vpop.f32.mrf.mxu1 }
 0x32d   :  { %v420_v10 = vpack.c.bf16 %v419_v8, %v419_v8 }
 0x32e   :  { %v683_v11 = vpop.f32.mrf.mxu1 }
 0x32f   :  { %701 = vmatmul.mubr.bf16.vlgmr.msra.gmra.mxu0 %v420_v10 }
 0x3ef   :  { %v524_v14 = vpop.f32.mrf.mxu0 }
 0x3f0   :  { %v525_v15 = vadd.f32 %v524_v14, %v441_v0 }
 0x3f1   :  { %v702_v16 = vpop.f32.mrf.mxu0 }
 0x3f2   :  { %v530_v17 = vmax.f32 %v525_v15, 0.0 }
 0x3f3   :  { %v527_v18 = vpop.f32.mrf.mxu0 }
 0x3f4   :  { %531 = vadd.xlane.f32.xlu0 %v530_v17 }
 0x3f5   :  { %v703_v20 = vpop.f32.mrf.mxu0 }
 0x40a   :  { %536 = vperm.xlu0 %710, %v414_v6  }
 0x47d   :  { %v532_v22 = vpop.xlane.xlu0 %531 }
 0x47e   :  { %v533_v24 = vmul.f32 0.25, %v532_v22 }
 0x485   :  { %v537_v23 = vpop.permute.xlu0 %536 }
 0x486   :  { %v539_v25 = vadd.f32 %v537_v23, %v530_v17 }
 0x488   :  { %v540_v26 = vsub.f32 %v539_v25, %v533_v24 }
 0x48a   :  { %541 = vst [vmem:[%s872_s4] sm:$0xff] %v540_v26 }
 0x48b   :  { %546 = vsyncpa [#allocation3], 1 }

</bundles_post_ra>
